<compile_context>
chip_gen: v6e
topology: v6e:2x2x1
jax: 0.10.0
libtpu: 0.0.40
codegen_flags: <defaults>
</compile_context>

<pallas_src>
import jax
import jax.numpy as jnp
from jax import lax
from jax.experimental import pallas as pl
from jax.experimental.pallas import tpu as pltpu

K1, K2 = 64, 128          # branch input features
N1, N2 = 32, 64           # branch output features


def _fused_branches_kernel(x1_ref, x2_ref, w1_ref, w2_ref, b1_ref, b2_ref,
                           buf_ref, o1_ref, o2_ref):
    # x1_ref: [TM, 64]   w1_ref: [32, 64]   b1_ref/buf_ref: [1, 32]   o1_ref: [TM, 32]
    # x2_ref: [TM, 128]  w2_ref: [64, 128]  b2_ref:         [1, 64]   o2_ref: [TM, 64]
    # Contract feature axes against the untransposed nn.Linear weights (x @ W^T).
    h1 = lax.dot_general(
        x1_ref[...], w1_ref[...],
        dimension_numbers=(((1,), (1,)), ((), ())),
        preferred_element_type=jnp.float32)              # [TM, 32]
    h2 = lax.dot_general(
        x2_ref[...], w2_ref[...],
        dimension_numbers=(((1,), (1,)), ((), ())),
        preferred_element_type=jnp.float32)              # [TM, 64]
    buf = buf_ref[...]                                   # [1, 32]
    # ReLU(h + b) + buf  ==  max(h + b + buf, buf)   (saves one VPU add per element)
    o1_ref[...] = jnp.maximum(h1 + b1_ref[...] + buf, buf)
    o2_ref[...] = jnp.maximum(h2 + b2_ref[...], 0.0)


def _round_up(n, m):
    return ((n + m - 1) // m) * m


@jax.jit
def m_forward(x1, x2, w1, b1, w2, b2, buffer):
    """Pallas implementation of M.forward.

    x1: [B, 64]   w1: [32, 64]   b1: [32]
    x2: [B, 128]  w2: [64, 128]  b2: [64]
    buffer: [32]
    Returns (out1 [B, 32], out2 [B, 64]).
    """
    B = x1.shape[0]
    f32 = jnp.float32

    b1_2d = b1.reshape(1, N1).astype(f32)
    b2_2d = b2.reshape(1, N2).astype(f32)
    buf_2d = buffer.reshape(1, N1).astype(f32)

    # Batch tile: as large as is safe (amortizes the ~0.35us per-grid-step cost; TM>=2048
    # sits near the HBM roofline) but capped at 4096 so double-buffered x+out tiles stay
    # ~9 MiB — under the default scoped-VMEM limit on every generation (v5e 16 MiB,
    # v7x 32 MiB). cdiv(B, 2) guarantees >= 2 grid steps whenever B > 8 so the "parallel"
    # axis actually occupies both v7x TensorCores.
    if B <= 8:
        TM = B
    else:
        TM = min(_round_up(pl.cdiv(B, 2), 8), 4096)
    grid = (pl.cdiv(B, TM),)

    cost = pl.CostEstimate(
        flops=2 * B * (K1 * N1 + K2 * N2),
        transcendentals=0,
        bytes_accessed=4 * (x1.size + x2.size + w1.size + w2.size
                            + b1.size + b2.size + buffer.size
                            + B * N1 + B * N2),
    )

    out1, out2 = pl.pallas_call(
        _fused_branches_kernel,
        out_shape=(jax.ShapeDtypeStruct((B, N1), f32),
                   jax.ShapeDtypeStruct((B, N2), f32)),
        grid=grid,
        in_specs=[
            pl.BlockSpec((TM, K1), lambda i: (i, 0)),   # x1: tiled over batch
            pl.BlockSpec((TM, K2), lambda i: (i, 0)),   # x2: tiled over batch
            pl.BlockSpec((N1, K1), lambda i: (0, 0)),   # w1: resident
            pl.BlockSpec((N2, K2), lambda i: (0, 0)),   # w2: resident
            pl.BlockSpec((1, N1), lambda i: (0, 0)),    # b1: resident
            pl.BlockSpec((1, N2), lambda i: (0, 0)),    # b2: resident
            pl.BlockSpec((1, N1), lambda i: (0, 0)),    # buffer: resident
        ],
        out_specs=(
            pl.BlockSpec((TM, N1), lambda i: (i, 0)),
            pl.BlockSpec((TM, N2), lambda i: (i, 0)),
        ),
        compiler_params=pltpu.CompilerParams(
            dimension_semantics=("parallel",),
            vmem_limit_bytes=32 * 1024 * 1024),
        cost_estimate=cost,
    )(x1.astype(f32), x2.astype(f32), w1.astype(f32), w2.astype(f32),
      b1_2d, b2_2d, buf_2d)

    return out1, out2


def _ref_forward(x1, x2, w1, b1, w2, b2, buffer):
    out1 = jnp.maximum(x1 @ w1.T + b1, 0.0) + buffer
    out2 = jnp.maximum(x2 @ w2.T + b2, 0.0)
    return out1, out2


if __name__ == "__main__":
    key = jax.random.PRNGKey(0)
    k_x1, k_x2, k_w1, k_b1, k_w2, k_b2 = jax.random.split(key, 6)

    # Deterministic parameter init (synthetic; matches nn.Linear shapes).
    w1 = jax.random.normal(k_w1, (32, 64), dtype=jnp.float32) * 0.1
    b1 = jax.random.normal(k_b1, (32,), dtype=jnp.float32) * 0.1
    w2 = jax.random.normal(k_w2, (64, 128), dtype=jnp.float32) * 0.1
    b2 = jax.random.normal(k_b2, (64,), dtype=jnp.float32) * 0.1
    buffer = jnp.ones((32,), dtype=jnp.float32)

    ok = True
    for B in (8, 48):  # single-tile path and multi-step (2-TC capable) grid path
        kx1, kx2 = jax.random.split(jax.random.fold_in(k_x1, B), 2)
        x1 = jax.random.normal(kx1, (B, 64), dtype=jnp.float32)
        x2 = jax.random.normal(kx2, (B, 128), dtype=jnp.float32)

        out1, out2 = jax.block_until_ready(
            m_forward(x1, x2, w1, b1, w2, b2, buffer))
        ref1, ref2 = _ref_forward(x1, x2, w1, b1, w2, b2, buffer)

        ok &= out1.shape == (B, 32) and out2.shape == (B, 64)
        ok &= bool(jnp.allclose(out1, ref1, atol=1e-5, rtol=1e-5))
        ok &= bool(jnp.allclose(out2, ref2, atol=1e-5, rtol=1e-5))

    assert ok
    print("KERNEL_OK")
</pallas_src>

<mosaic_0001>
module attributes {stable_mosaic.version = 11 : i64} {
  func.func @_fused_branches_kernel(%arg0: i32, %arg1: memref<8x64xf32, #tpu.memory_space<vmem>>, %arg2: memref<8x128xf32, #tpu.memory_space<vmem>>, %arg3: memref<32x64xf32, #tpu.memory_space<vmem>>, %arg4: memref<64x128xf32, #tpu.memory_space<vmem>>, %arg5: memref<1x32xf32, #tpu.memory_space<vmem>>, %arg6: memref<1x64xf32, #tpu.memory_space<vmem>>, %arg7: memref<1x32xf32, #tpu.memory_space<vmem>>, %arg8: memref<8x32xf32, #tpu.memory_space<vmem>>, %arg9: memref<8x64xf32, #tpu.memory_space<vmem>>) attributes {dimension_semantics = [#tpu.dimension_semantics<parallel>], iteration_bounds = array<i64: 1>, scalar_prefetch = 0 : i64, scratch_operands = 0 : i64, tpu.core_type = #tpu.core_type<tc>, window_params = [{transform_indices = @transform_0, window_bounds = array<i64: 8, 64>}, {transform_indices = @transform_1, window_bounds = array<i64: 8, 128>}, {pipeline_mode = #tpu.pipeline_mode<synchronous>, transform_indices = @transform_2, window_bounds = array<i64: 32, 64>}, {pipeline_mode = #tpu.pipeline_mode<synchronous>, transform_indices = @transform_3, window_bounds = array<i64: 64, 128>}, {pipeline_mode = #tpu.pipeline_mode<synchronous>, transform_indices = @transform_4, window_bounds = array<i64: 1, 32>}, {pipeline_mode = #tpu.pipeline_mode<synchronous>, transform_indices = @transform_5, window_bounds = array<i64: 1, 64>}, {pipeline_mode = #tpu.pipeline_mode<synchronous>, transform_indices = @transform_6, window_bounds = array<i64: 1, 32>}, {transform_indices = @transform_7, window_bounds = array<i64: 8, 32>}, {transform_indices = @transform_8, window_bounds = array<i64: 8, 64>}]} {
    %c0 = arith.constant 0 : index
    %c0_0 = arith.constant 0 : index
    %0 = vector.load %arg1[%c0, %c0_0] : memref<8x64xf32, #tpu.memory_space<vmem>>, vector<8x64xf32>
    %c0_1 = arith.constant 0 : index
    %c0_2 = arith.constant 0 : index
    %1 = vector.load %arg3[%c0_1, %c0_2] : memref<32x64xf32, #tpu.memory_space<vmem>>, vector<32x64xf32>
    %cst = arith.constant dense<0.000000e+00> : vector<8x32xf32>
    %2 = tpu.matmul %0, %1, %cst {dimension_numbers = #tpu.dot_dimension_numbers<[1], [1], [0], [0], [0, 0, 1, 0], [], []>} : vector<8x64xf32>, vector<32x64xf32>, vector<8x32xf32> -> vector<8x32xf32>
    %c0_3 = arith.constant 0 : index
    %c0_4 = arith.constant 0 : index
    %3 = vector.load %arg2[%c0_3, %c0_4] : memref<8x128xf32, #tpu.memory_space<vmem>>, vector<8x128xf32>
    %c0_5 = arith.constant 0 : index
    %c0_6 = arith.constant 0 : index
    %4 = vector.load %arg4[%c0_5, %c0_6] : memref<64x128xf32, #tpu.memory_space<vmem>>, vector<64x128xf32>
    %cst_7 = arith.constant dense<0.000000e+00> : vector<8x64xf32>
    %5 = tpu.matmul %3, %4, %cst_7 {dimension_numbers = #tpu.dot_dimension_numbers<[1], [1], [0], [0], [0, 0, 1, 0], [], []>} : vector<8x128xf32>, vector<64x128xf32>, vector<8x64xf32> -> vector<8x64xf32>
    %c0_8 = arith.constant 0 : index
    %c0_9 = arith.constant 0 : index
    %6 = vector.load %arg7[%c0_8, %c0_9] : memref<1x32xf32, #tpu.memory_space<vmem>>, vector<1x32xf32>
    %c0_10 = arith.constant 0 : index
    %c0_11 = arith.constant 0 : index
    %7 = vector.load %arg5[%c0_10, %c0_11] : memref<1x32xf32, #tpu.memory_space<vmem>>, vector<1x32xf32>
    %8 = vector.broadcast %7 : vector<1x32xf32> to vector<8x32xf32>
    %9 = arith.addf %2, %8 : vector<8x32xf32>
    %10 = vector.broadcast %6 : vector<1x32xf32> to vector<8x32xf32>
    %11 = arith.addf %9, %10 : vector<8x32xf32>
    %12 = vector.broadcast %6 : vector<1x32xf32> to vector<8x32xf32>
    %13 = arith.maximumf %11, %12 : vector<8x32xf32>
    %c0_12 = arith.constant 0 : index
    %c0_13 = arith.constant 0 : index
    %14 = vector.load %arg8[%c0_12, %c0_13] : memref<8x32xf32, #tpu.memory_space<vmem>>, vector<8x32xf32>
    tpu.vector_store %arg8[%c0_12, %c0_13], %13 {strides = array<i32>} : memref<8x32xf32, #tpu.memory_space<vmem>>, vector<8x32xf32>,
    %c0_14 = arith.constant 0 : index
    %c0_15 = arith.constant 0 : index
    %15 = vector.load %arg6[%c0_14, %c0_15] : memref<1x64xf32, #tpu.memory_space<vmem>>, vector<1x64xf32>
    %16 = vector.broadcast %15 : vector<1x64xf32> to vector<8x64xf32>
    %17 = arith.addf %5, %16 : vector<8x64xf32>
    %cst_16 = arith.constant 0.000000e+00 : f32
    %18 = vector.broadcast %cst_16 : f32 to vector<8x64xf32>
    %19 = arith.maximumf %17, %18 : vector<8x64xf32>
    %c0_17 = arith.constant 0 : index
    %c0_18 = arith.constant 0 : index
    %20 = vector.load %arg9[%c0_17, %c0_18] : memref<8x64xf32, #tpu.memory_space<vmem>>, vector<8x64xf32>
    tpu.vector_store %arg9[%c0_17, %c0_18], %19 {strides = array<i32>} : memref<8x64xf32, #tpu.memory_space<vmem>>, vector<8x64xf32>,
    return
  }
  func.func @transform_0(%arg0: i32) -> (i32, i32) {
    %c0_i32 = arith.constant 0 : i32
    %c0_i32_0 = arith.constant 0 : i32
    return %arg0, %c0_i32 : i32, i32
  }
  func.func @transform_1(%arg0: i32) -> (i32, i32) {
    %c0_i32 = arith.constant 0 : i32
    %c0_i32_0 = arith.constant 0 : i32
    return %arg0, %c0_i32 : i32, i32
  }
  func.func @transform_2(%arg0: i32) -> (i32, i32) {
    %c0_i32 = arith.constant 0 : i32
    %c0_i32_0 = arith.constant 0 : i32
    %c0_i32_1 = arith.constant 0 : i32
    return %c0_i32, %c0_i32_0 : i32, i32
  }
  func.func @transform_3(%arg0: i32) -> (i32, i32) {
    %c0_i32 = arith.constant 0 : i32
    %c0_i32_0 = arith.constant 0 : i32
    %c0_i32_1 = arith.constant 0 : i32
    return %c0_i32, %c0_i32_0 : i32, i32
  }
  func.func @transform_4(%arg0: i32) -> (i32, i32) {
    %c0_i32 = arith.constant 0 : i32
    %c0_i32_0 = arith.constant 0 : i32
    %c0_i32_1 = arith.constant 0 : i32
    return %c0_i32, %c0_i32_0 : i32, i32
  }
  func.func @transform_5(%arg0: i32) -> (i32, i32) {
    %c0_i32 = arith.constant 0 : i32
    %c0_i32_0 = arith.constant 0 : i32
    %c0_i32_1 = arith.constant 0 : i32
    return %c0_i32, %c0_i32_0 : i32, i32
  }
  func.func @transform_6(%arg0: i32) -> (i32, i32) {
    %c0_i32 = arith.constant 0 : i32
    %c0_i32_0 = arith.constant 0 : i32
    %c0_i32_1 = arith.constant 0 : i32
    return %c0_i32, %c0_i32_0 : i32, i32
  }
  func.func @transform_7(%arg0: i32) -> (i32, i32) {
    %c0_i32 = arith.constant 0 : i32
    %c0_i32_0 = arith.constant 0 : i32
    return %arg0, %c0_i32 : i32, i32
  }
  func.func @transform_8(%arg0: i32) -> (i32, i32) {
    %c0_i32 = arith.constant 0 : i32
    %c0_i32_0 = arith.constant 0 : i32
    return %arg0, %c0_i32 : i32, i32
  }
}

</mosaic_0001>

<bundles_post_ra>
// kernel: m_forward.1
= control target key start
LH: loop header
LB: loop body
LE: loop exit
PB: predicated region body
PF: predicated region fallthrough
CT: control target
= control target key end

     0   :  { %14 = vsyncpa [#allocation3], 0  ;;  %s589_s0 = inlined_call_operand.hbm [shape: f32[8,64], index: 0, kind: input, shape index: {}]   ;;  %s590_s1 = inlined_call_operand.hbm [shape: f32[8,128], index: 1, kind: input, shape index: {}]   ;;  %s591_s2 = inlined_call_operand.hbm [shape: f32[32,64], index: 2, kind: input, shape index: {}]   ;;  %s592_s3 = inlined_call_operand.hbm [shape: f32[64,128], index: 3, kind: input, shape index: {}]   ;;  %s593_s4 = inlined_call_operand.vmem [shape: f32[1,32], index: 4, kind: input, shape index: {}]   ;;  %s594_s5 = inlined_call_operand.vmem [shape: f32[1,64], index: 5, kind: input, shape index: {}]   ;;  %s595_s6 = inlined_call_operand.vmem [shape: f32[1,32], index: 6, kind: input, shape index: {}]   ;;  %s596_s7 = inlined_call_operand.hbm [shape: f32[8,32], index: 7, kind: output, shape index: {0}]   ;;  %s597_s8 = inlined_call_operand.hbm [shape: f32[8,64], index: 8, kind: output, shape index: {1}]  }
   0x1   :  { %15 = vsyncpa [#allocation6], 0 }
   0x2   :  { %16 = vsyncpa [#allocation9], 0 }
   0x3   :  { %17 = vsyncpa [#allocation4], 0 }
   0x4   :  { %18 = vsyncpa [#allocation12], 0  ;;  %s501_s27 = smov [#allocation5]   ;;  %s502_s29 = smov [#allocation2]  }
   0x5   :  { %s35_s28 = sshll.u32 %s501_s27, 4  ;;  %s25_s30 = sshll.u32 %s502_s29, 4  ;;  %s36_s28 = int_to_ptr.vmem [resolvable:$true] %s35_s28  ;;  %s26_s30 = int_to_ptr.vmem [resolvable:$true] %s25_s30 }
   0x6   :  { %s379_s9 = scalar_lea.vmem %s36_s28, 128  ;;  %p384_p1 = scmp.lt.s32.totalorder %s36_s28, %s36_s28 }
   0x7   :  { %p380_p0 = scmp.ne.s32.totalorder %s36_s28, %s379_s9  ;;  %p385_p2 = scmp.lt.s32.totalorder %s379_s9, %s379_s9 }
   0x9   :  { %p386_p3 = por %p385_p2, %p384_p1 }
   0xb   :  { %p387_p4 = pnand %p386_p3, %p380_p0 }
   0xd   :  { %390 = shalt.err (!%p387_p4)
}
   0xe   :  { %38 = dma.hbm_to_vmem [thread:$0]  %s590_s1, 128, %s36_s28, [#allocation6]  }
   0xf   :  { %s399_s12 = scalar_lea.vmem %s26_s30, 128  ;;  %p404_p6 = scmp.lt.s32.totalorder %s26_s30, %s26_s30 }
  0x10   :  { %p400_p5 = scmp.ne.s32.totalorder %s26_s30, %s399_s12  ;;  %p405_p7 = scmp.lt.s32.totalorder %s399_s12, %s399_s12 }
  0x12   :  { %p406_p8 = por %p405_p7, %p404_p6 }
  0x14   :  { %p407_p9 = pnand %p406_p8, %p400_p5 }
  0x16   :  { %410 = shalt.err (!%p407_p9)
}
  0x17   :  { %28 = dma.hbm_to_vmem [thread:$0]  %s589_s0, 128, %s26_s30, [#allocation3]  }
  0x18   :  { %s503_s15 = smov [#allocation7]  }
  0x19   :  { %s44_s16 = sshll.u32 %s503_s15, 4  ;;  %s45_s16 = int_to_ptr.vmem [resolvable:$true] %s44_s16 }
  0x1a   :  { %s419_s17 = scalar_lea.vmem %s45_s16, 512  ;;  %p424_p11 = scmp.lt.s32.totalorder %s45_s16, %s45_s16 }
  0x1b   :  { %p420_p10 = scmp.ne.s32.totalorder %s45_s16, %s419_s17  ;;  %p425_p12 = scmp.lt.s32.totalorder %s419_s17, %s419_s17 }
  0x1d   :  { %p426_p13 = por %p425_p12, %p424_p11 }
  0x1f   :  { %p427_p0 = pnand %p426_p13, %p420_p10 }
  0x21   :  { %430 = shalt.err (!%p427_p0)
}
  0x22   :  { %s504_s1 = smov 128   ;;  %s505_s18 = smov 8  }
  0x23   :  { %50 = dma.hbm_to_vmem [thread:$0]  %s591_s2, 512, %s45_s16, [#allocation6], %s504_s1, %s504_s1, %s505_s18  }
  0x24   :  { %s506_s21 = smov [#allocation8]  }
  0x25   :  { %s56_s22 = sshll.u32 %s506_s21, 4  ;;  %s57_s22 = int_to_ptr.vmem [resolvable:$true] %s56_s22 }
  0x26   :  { %s439_s0 = scalar_lea.vmem %s57_s22, 1024  ;;  %p444_p2 = scmp.lt.s32.totalorder %s57_s22, %s57_s22 }
  0x27   :  { %p440_p1 = scmp.ne.s32.totalorder %s57_s22, %s439_s0  ;;  %p445_p3 = scmp.lt.s32.totalorder %s439_s0, %s439_s0 }
  0x29   :  { %p446_p4 = por %p445_p3, %p444_p2 }
  0x2b   :  { %p447_p5 = pnand %p446_p4, %p440_p1 }
  0x2d   :  { %450 = shalt.err (!%p447_p5)
}
  0x2e   :  { %62 = dma.hbm_to_vmem [thread:$0]  %s592_s3, 1024, %s57_s22, [#allocation9], %s504_s1, %s504_s1, %s505_s18  }
  0x2f   :  { %491 = dma.done.wait [#allocation3], 128  }
  0x30   :  { %492 = vsyncadd [#allocation3], 4294967168 }
  0x31   :  { %493 = dma.done.wait [#allocation6], 640  }
  0x32   :  { %494 = vsyncadd [#allocation6], 4294966656 }
  0x33   :  { %495 = dma.done.wait [#allocation9], 1024  }
  0x34   :  { %496 = vsyncadd [#allocation9], 4294966272  ;;  %v507_v0 = vmov 0.0   ;;  %vm508_vm0 = vmmov 0   ;;  %vm103_vm1 = vcmask 523264   ;;  %v94_v1 = vld [vmem:[#allocation8 + $0x38] sm:$0xff] }
  0x35   :  { %342 = vmatprep.subr.mxu1 %v507_v0  ;;  %331 = vmatprep.subr.mxu0 %v507_v0  ;;  %v85_v2 = vld [vmem:[#allocation7 + $0x18] sm:$0xff]  ;;  %v93_v3 = vld [vmem:[#allocation8 + $0x30] sm:$0xff]  ;;  %v92_v5 = vld [vmem:[#allocation8 + $0x28] sm:$0xff]  ;;  %s509_s27 = smov [#allocation10]   ;;  %vm197_vm2 = vcmask 261120  }
  0x36   :  { %339 = vmatprep.mubr.msk.f32.mxu0 %vm508_vm0, %v507_v0  ;;  %358 = vmatprep.mubr.msk.f32.mxu1 %vm508_vm0, %v507_v0  ;;  %v84_v4 = vld [vmem:[#allocation7 + $0x10] sm:$0xff]  ;;  %v83_v6 = vld [vmem:[#allocation7 + $0x8] sm:$0xff]  ;;  %v91_v7 = vld [vmem:[#allocation8 + $0x20] sm:$0xff]  ;;  %s284_s28 = sshll.u32 %s509_s27, 4  ;;  %s285_s28 = int_to_ptr.vmem [resolvable:$true] %s284_s28 }
  0x37   :  { %343 = vmatpush3.xpose.msra.mxu1 %v94_v1  ;;  %332 = vmatpush3.xpose.msk.msra.mxu0 %vm103_vm1, %v85_v2  ;;  %v82_v8 = vld [vmem:[#allocation7] sm:$0xff]  ;;  %v90_v9 = vld [vmem:[#allocation8 + $0x18] sm:$0xff]  ;;  %v81_v10 = vld [vmem:[#allocation2] sm:$0xff]  ;;  %s451_s29 = scalar_lea.vmem %s285_s28, 128  ;;  %p456_p7 = scmp.lt.s32.totalorder %s285_s28, %s285_s28 }
  0x38   :  { %344 = vmatprep.subr.mxu1 %v507_v0  ;;  %333 = vmatprep.subr.mxu0 %v507_v0  ;;  %v89_v11 = vld [vmem:[#allocation8 + $0x10] sm:$0xff]  ;;  %v88_v12 = vld [vmem:[#allocation8 + $0x8] sm:$0xff]  ;;  %v87_v13 = vld [vmem:[#allocation8] sm:$0xff]  ;;  %p452_p6 = scmp.ne.s32.totalorder %s285_s28, %s451_s29  ;;  %p457_p8 = scmp.lt.s32.totalorder %s451_s29, %s451_s29 }
  0x39   :  { %v86_v14 = vld [vmem:[#allocation5] sm:$0xff]  ;;  %v309_v15 = vld [vmem:[%s593_s4] ss:$0 sm:$0xff] }
  0x3a   :  { %v315_v16 = vld [vmem:[%s595_s6] ss:$0 sm:$0xff]  ;;  %p458_p9 = por %p457_p8, %p456_p7 }
  0x3b   :  { %345 = vmatpush3.xpose.msra.mxu1 %v93_v3  ;;  %334 = vmatpush3.xpose.msk.msra.mxu0 %vm103_vm1, %v84_v4 }
  0x3c   :  { %346 = vmatprep.subr.mxu1 %v507_v0  ;;  %335 = vmatprep.subr.mxu0 %v507_v0  ;;  %p459_p10 = pnand %p458_p9, %p452_p6 }
  0x3f   :  { %347 = vmatpush3.xpose.msra.mxu1 %v92_v5  ;;  %336 = vmatpush3.xpose.msk.msra.mxu0 %vm103_vm1, %v83_v6 }
  0x40   :  { %348 = vmatprep.subr.mxu1 %v507_v0  ;;  %337 = vmatprep.subr.mxu0 %v507_v0 }
  0x43   :  { %349 = vmatpush3.xpose.msra.mxu1 %v91_v7  ;;  %338 = vmatpush3.xpose.msk.msra.mxu0 %vm103_vm1, %v82_v8 }
  0x44   :  { %350 = vmatprep.subr.mxu1 %v507_v0 }
  0x46   :  { %340 = vmatmul.mubr.msk.f32.vlgmr.msra.gmra.mxu0 %vm103_vm1, %v81_v10 }
  0x47   :  { %351 = vmatpush3.xpose.msra.mxu1 %v90_v9 }
  0x48   :  { %352 = vmatprep.subr.mxu1 %v507_v0 }
  0x4b   :  { %353 = vmatpush3.xpose.msra.mxu1 %v89_v11 }
  0x4c   :  { %354 = vmatprep.subr.mxu1 %v507_v0 }
  0x4f   :  { %355 = vmatpush3.xpose.msra.mxu1 %v88_v12 }
  0x50   :  { %356 = vmatprep.subr.mxu1 %v507_v0 }
  0x53   :  { %357 = vmatpush3.xpose.msra.mxu1 %v87_v13 }
  0x56   :  { %359 = vmatmul.mubr.f32.vlgmr.msra.gmra.mxu1 %v86_v14 }
 0x106   :  { %v185_v17 = vpop.f32.mrf.mxu0 }
 0x107   :  { %v186_v18 = vadd.f32 %v309_v15, %v185_v17 }
 0x108   :  { %v341_v19 = vpop.f32.mrf.mxu0 }
 0x109   :  { %v195_v20 = vadd.f32 %v315_v16, %v186_v18 }
 0x10b   :  { %v196_v21 = vmax.f32 %v195_v20, %v315_v16 }
 0x10d   :  { %198 = vst.msk [vmem:[#allocation10] sm:$0xff] %vm197_vm2, %v196_v21 }
 0x10e   :  { %462 = shalt.err (!%p459_p10)
}
 0x10f   :  { %287 = dma.vmem_to_hbm [thread:$0]  %s285_s28, 128, %s596_s7, [#allocation4]   ;;  %v316_v22 = vld [vmem:[%s594_s5] ss:$0 sm:$0xff] }
 0x110   :  { %s510_s10 = smov [#allocation11]  }
 0x111   :  { %s294_s11 = sshll.u32 %s510_s10, 4  ;;  %s295_s11 = int_to_ptr.vmem [resolvable:$true] %s294_s11 }
 0x112   :  { %s471_s12 = scalar_lea.vmem %s295_s11, 128  ;;  %p476_p12 = scmp.lt.s32.totalorder %s295_s11, %s295_s11 }
 0x113   :  { %p472_p11 = scmp.ne.s32.totalorder %s295_s11, %s471_s12  ;;  %p477_p13 = scmp.lt.s32.totalorder %s471_s12, %s471_s12 }
 0x115   :  { %p478_p0 = por %p477_p13, %p476_p12 }
 0x116   :  { %v272_v23 = vpop.f32.mrf.mxu1 }
 0x117   :  { %v273_v24 = vadd.f32 %v316_v22, %v272_v23  ;;  %p479_p1 = pnand %p478_p0, %p472_p11 }
 0x118   :  { %v360_v25 = vpop.f32.mrf.mxu1 }
 0x119   :  { %v276_v26 = vmax.f32 %v273_v24, 0.0 }
 0x11b   :  { %277 = vst.msk [vmem:[#allocation11] sm:$0xff] %vm103_vm1, %v276_v26 }
 0x11c   :  { %482 = shalt.err (!%p479_p1)
}
 0x11d   :  { %297 = dma.vmem_to_hbm [thread:$0]  %s295_s11, 128, %s597_s8, [#allocation12]  }
 0x11e   :  { %497 = dma.done.wait [#allocation4], 128  }
 0x11f   :  { %498 = vsyncadd [#allocation4], 4294967168 }
 0x120   :  { %499 = dma.done.wait [#allocation12], 128  }
 0x121   :  { %500 = vsyncadd [#allocation12], 4294967168 }
 0x122   :  { %304 = vsyncpa [#allocation3], 1 }
 0x123   :  { %305 = vsyncpa [#allocation6], 1 }
 0x124   :  { %306 = vsyncpa [#allocation9], 1 }
 0x125   :  { %307 = vsyncpa [#allocation4], 1 }
 0x126   :  { %308 = vsyncpa [#allocation12], 1 }

</bundles_post_ra>
